<compile_context>
chip_gen: v7x
topology: tpu7x:2x2x1
jax: 0.10.0
libtpu: 0.0.40
codegen_flags: <defaults>
</compile_context>

<pallas_src>
import math

import jax
import jax.numpy as jnp
import numpy as np
from jax.experimental import pallas as pl
from jax.experimental.pallas import tpu as pltpu

_C_PAD = 128  # lane-dense padding of the hidden (16) / class (nclass) dims


def _round_up(x, m):
    return ((x + m - 1) // m) * m


def _make_propagate_kernel(epilogue, nclass=None):
    """One normalized GCN propagation over streamed adjacency tiles.

    out_row = epilogue( d_row * (sum_k adj[row,k] @ Vs[k] + Vs[row]) + bias )
    with Vs = d * V; adj streamed as (TM, TK) tiles, f32 accumulator in VMEM.
    """

    def kernel(adj_ref, vsk_ref, vsr_ref, d_ref, b_ref, out_ref, acc_ref):
        k = pl.program_id(1)

        @pl.when(k == 0)
        def _():
            acc_ref[...] = jnp.zeros_like(acc_ref)

        a = adj_ref[...].astype(jnp.float32)  # bf16 {0,1} -> exact f32
        acc_ref[...] += jnp.dot(a, vsk_ref[...],
                                preferred_element_type=jnp.float32)

        @pl.when(k == pl.num_programs(1) - 1)
        def _():
            # d*(adj@Vs) + d^2*V  ==  d*(acc + Vs_row)   (self loop folded)
            h = d_ref[...] * (acc_ref[...] + vsr_ref[...]) + b_ref[...]
            if epilogue == "relu":
                out_ref[...] = jnp.maximum(h, 0.0)
            else:  # masked log_softmax over the first `nclass` lanes (T = 1)
                col = jax.lax.broadcasted_iota(jnp.int32, h.shape, 1)
                valid = col < nclass
                m = jnp.max(jnp.where(valid, h, -jnp.inf), axis=1,
                            keepdims=True)
                z = h - m
                e = jnp.where(valid, jnp.exp(z), 0.0)
                lse = jnp.log(jnp.sum(e, axis=1, keepdims=True))
                out_ref[...] = z - lse

    return kernel


def _propagate(adj_bf16, vs, d, bias, *, tm, tk, epilogue, nclass=None):
    """Tiled, auto-pipelined adjacency sweep: one pass per GCN layer."""
    n_pad = adj_bf16.shape[0]
    grid = (n_pad // tm, n_pad // tk)
    flops = 2 * n_pad * n_pad * _C_PAD
    bytes_accessed = (adj_bf16.size * 2                 # dominant bf16 stream
                      + (n_pad // tm) * vs.size * 4     # Vs re-read per row tile
                      + 3 * n_pad * _C_PAD * 4)
    return pl.pallas_call(
        _make_propagate_kernel(epilogue, nclass),
        out_shape=jax.ShapeDtypeStruct((n_pad, _C_PAD), jnp.float32),
        grid_spec=pltpu.PrefetchScalarGridSpec(
            num_scalar_prefetch=0,
            grid=grid,
            in_specs=[
                pl.BlockSpec((tm, tk), lambda i, k: (i, k)),      # adj tile
                pl.BlockSpec((tk, _C_PAD), lambda i, k: (k, 0)),  # Vs (k slab)
                pl.BlockSpec((tm, _C_PAD), lambda i, k: (i, 0)),  # Vs (row slab)
                pl.BlockSpec((tm, 1), lambda i, k: (i, 0)),       # d rows
                pl.BlockSpec((1, _C_PAD), lambda i, k: (0, 0)),   # bias
            ],
            out_specs=pl.BlockSpec((tm, _C_PAD), lambda i, k: (i, 0)),
            scratch_shapes=[pltpu.VMEM((tm, _C_PAD), jnp.float32)],
        ),
        compiler_params=pltpu.CompilerParams(
            dimension_semantics=("parallel", "arbitrary"),
            vmem_limit_bytes=32 * 1024 * 1024,
        ),
        cost_estimate=pl.CostEstimate(
            flops=flops,
            transcendentals=(n_pad * _C_PAD if epilogue == "log_softmax" else 0),
            bytes_accessed=bytes_accessed,
        ),
    )(adj_bf16, vs, vs, d, bias)


def _plan_tiles(n, tm=None, tk=None):
    # Defaults safe for v5e/v6e/v7x: adj tile = 256x1024 bf16 = 512 KiB per
    # buffer (~1 MiB double-buffered) + tiny resident operands; well under the
    # 16/32 MiB scoped-VMEM defaults and v7x's 64 MiB physical VMEM.
    if tk is None:
        tk = min(1024, _round_up(n, 128))
    if tm is None:
        tm = 256 if tk % 256 == 0 else 128
        tm = min(tm, tk)
    assert tm % 16 == 0 and tk % 128 == 0, (tm, tk)
    lcm = tm * tk // math.gcd(tm, tk)
    n_pad = _round_up(n, lcm)
    return tm, tk, n_pad


def rsgnn_forward(adj, x, w1, b1, w2, b2, *, tm=None, tk=None):
    """Dense-adjacency RSGNN inference forward. Returns log-probs [N, nclass]."""
    n, nfeat = x.shape
    nhid = w1.shape[1]
    nclass = w2.shape[1]
    tm, tk, n_pad = _plan_tiles(n, tm, tk)
    f32 = jnp.float32

    # Zero-pad the graph to the tile grid; padded nodes are isolated (deg = 1)
    # with zero features, so they never influence real rows and are sliced off.
    adj_p = jnp.zeros((n_pad, n_pad), f32).at[:n, :n].set(adj.astype(f32))
    adj_bf16 = adj_p.astype(jnp.bfloat16)   # exact for {0,1} adjacency values
    x_p = jnp.zeros((n_pad, nfeat), f32).at[:n].set(x.astype(f32))

    # Symmetric gcn_norm vector with self loop: d = (rowsum(adj) + 1)^{-1/2}.
    deg = jnp.sum(adj_p, axis=1, keepdims=True) + 1.0
    d = 1.0 / jnp.sqrt(deg)                                    # [n_pad, 1]

    # Lane-pad the tiny weights/biases to 128 output columns (zeros).
    w1_p = jnp.zeros((nfeat, _C_PAD), f32).at[:, :nhid].set(w1.astype(f32))
    b1_p = jnp.zeros((1, _C_PAD), f32).at[:, :nhid].set(
        b1.reshape(1, -1).astype(f32))
    w2_p = jnp.zeros((_C_PAD, _C_PAD), f32).at[:nhid, :nclass].set(
        w2.astype(f32))
    b2_p = jnp.zeros((1, _C_PAD), f32).at[:, :nclass].set(
        b2.reshape(1, -1).astype(f32))

    # Layer 1: GCNConv(nfeat, 16) + ReLU  (dropout = identity in eval mode).
    vs1 = d * jnp.dot(x_p, w1_p, preferred_element_type=f32)   # d ⊙ (X W1)
    h1 = _propagate(adj_bf16, vs1, d, b1_p, tm=tm, tk=tk, epilogue="relu")

    # Layer 2: GCNConv(16, nclass) + log_softmax (T = 1).
    vs2 = d * jnp.dot(h1, w2_p, preferred_element_type=f32)    # d ⊙ (H1 W2)
    out = _propagate(adj_bf16, vs2, d, b2_p, tm=tm, tk=tk,
                     epilogue="log_softmax", nclass=nclass)

    # forward_classifier slices logit[:n_real]; n_real == N for a dense graph.
    return out[:n, :nclass]


def _reference(adj, x, w1, b1, w2, b2):
    n = x.shape[0]
    a_sl = adj + jnp.eye(n, dtype=adj.dtype)
    deg = jnp.sum(a_sl, axis=1, keepdims=True)
    dd = 1.0 / jnp.sqrt(deg)
    a_hat = dd * a_sl * dd.T
    h1 = jnp.maximum(a_hat @ (x @ w1) + b1, 0.0)
    h2 = a_hat @ (h1 @ w2) + b2
    return jax.nn.log_softmax(h2, axis=1)


if __name__ == "__main__":
    # Small shapes consistent with RSGNN: model_s = GCN(nfeat, 16, 16, nclass).
    N, nfeat, hid, nclass = 200, 96, 16, 8

    key = jax.random.PRNGKey(0)
    k_adj, k_x, k_w1, k_w2 = jax.random.split(key, 4)

    # Random symmetric binary adjacency, zero diagonal.
    a = (jax.random.uniform(k_adj, (N, N)) < 0.05).astype(jnp.float32)
    adj = jnp.clip(a + a.T, 0.0, 1.0) * (1.0 - jnp.eye(N, dtype=jnp.float32))

    x = jax.random.normal(k_x, (N, nfeat), dtype=jnp.float32)

    # Deterministic Glorot-style init for GCNConv weights, zero biases
    # (matches PyG defaults; synthetic, not a checkpoint load).
    lim1 = float(np.sqrt(6.0 / (nfeat + hid)))
    w1 = jax.random.uniform(k_w1, (nfeat, hid), jnp.float32, -lim1, lim1)
    b1 = jnp.zeros((1, hid), dtype=jnp.float32)
    lim2 = float(np.sqrt(6.0 / (hid + nclass)))
    w2 = jax.random.uniform(k_w2, (hid, nclass), jnp.float32, -lim2, lim2)
    b2 = jnp.zeros((1, nclass), dtype=jnp.float32)

    # tm/tk overridden small so the (row, k) grid is genuinely multi-tile at
    # toy N (defaults tm=256/tk=1024 would collapse to a single block here).
    out = rsgnn_forward(adj, x, w1, b1, w2, b2, tm=64, tk=128)
    out = jax.block_until_ready(out)

    ref = _reference(adj, x, w1, b1, w2, b2)
    assert out.shape == (N, nclass)
    assert bool(jnp.allclose(out, ref, atol=1e-4, rtol=1e-4)), "mismatch vs reference"

    # TODO(synk): training-only paths (recons_loss, fit, create_fake_nodes,
    # add_nodes, graph_learner/decoder, process_mask masking) are not part of
    # forward() inference and are not implemented as kernels.
    print("KERNEL_OK")
</pallas_src>

<mosaic_0001>
module attributes {stable_mosaic.version = 11 : i64} {
  func.func @kernel(%arg0: i32, %arg1: i32, %arg2: memref<64x128xbf16, #tpu.memory_space<vmem>>, %arg3: memref<128x128xf32, #tpu.memory_space<vmem>>, %arg4: memref<64x128xf32, #tpu.memory_space<vmem>>, %arg5: memref<64x1xf32, #tpu.memory_space<vmem>>, %arg6: memref<1x128xf32, #tpu.memory_space<vmem>>, %arg7: memref<64x128xf32, #tpu.memory_space<vmem>>, %arg8: memref<64x128xf32, #tpu.memory_space<vmem>>) attributes {dimension_semantics = [#tpu.dimension_semantics<parallel>, #tpu.dimension_semantics<arbitrary>], iteration_bounds = array<i64: 4, 2>, scalar_prefetch = 0 : i64, scratch_operands = 1 : i64, tpu.core_type = #tpu.core_type<tc>, window_params = [{transform_indices = @transform_0, window_bounds = array<i64: 64, 128>}, {transform_indices = @transform_1, window_bounds = array<i64: 128, 128>}, {transform_indices = @transform_2, window_bounds = array<i64: 64, 128>}, {transform_indices = @transform_3, window_bounds = array<i64: 64, 1>}, {pipeline_mode = #tpu.pipeline_mode<synchronous>, transform_indices = @transform_4, window_bounds = array<i64: 1, 128>}, {transform_indices = @transform_5, window_bounds = array<i64: 64, 128>}]} {
    %c0_i32 = arith.constant 0 : i32
    %0 = arith.cmpi eq, %arg1, %c0_i32 : i32
    %1 = arith.extui %0 : i1 to i32
    %c0_i32_0 = arith.constant 0 : i32
    %2 = arith.cmpi ne, %1, %c0_i32_0 : i32
    scf.if %2 {
      %cst_9 = arith.constant 0.000000e+00 : f32
      %13 = vector.broadcast %cst_9 : f32 to vector<64x128xf32>
      %c0_10 = arith.constant 0 : index
      %c0_11 = arith.constant 0 : index
      %14 = vector.load %arg8[%c0_10, %c0_11] : memref<64x128xf32, #tpu.memory_space<vmem>>, vector<64x128xf32>
      tpu.vector_store %arg8[%c0_10, %c0_11], %13 {strides = array<i32>} : memref<64x128xf32, #tpu.memory_space<vmem>>, vector<64x128xf32>,
    } else {
    }
    %c0 = arith.constant 0 : index
    %c0_1 = arith.constant 0 : index
    %3 = vector.load %arg2[%c0, %c0_1] : memref<64x128xbf16, #tpu.memory_space<vmem>>, vector<64x128xbf16>
    %4 = arith.extf %3 : vector<64x128xbf16> to vector<64x128xf32>
    %c0_2 = arith.constant 0 : index
    %c0_3 = arith.constant 0 : index
    %5 = vector.load %arg8[%c0_2, %c0_3] : memref<64x128xf32, #tpu.memory_space<vmem>>, vector<64x128xf32>
    %c0_4 = arith.constant 0 : index
    %c0_5 = arith.constant 0 : index
    %6 = vector.load %arg3[%c0_4, %c0_5] : memref<128x128xf32, #tpu.memory_space<vmem>>, vector<128x128xf32>
    %cst = arith.constant dense<0.000000e+00> : vector<64x128xf32>
    %7 = tpu.matmul %4, %6, %cst {dimension_numbers = #tpu.dot_dimension_numbers<[1], [0], [0], [1], [0, 0, 1, 1], [], []>} : vector<64x128xf32>, vector<128x128xf32>, vector<64x128xf32> -> vector<64x128xf32>
    %8 = arith.addf %5, %7 : vector<64x128xf32>
    %c0_6 = arith.constant 0 : index
    %c0_7 = arith.constant 0 : index
    %9 = vector.load %arg8[%c0_6, %c0_7] : memref<64x128xf32, #tpu.memory_space<vmem>>, vector<64x128xf32>
    tpu.vector_store %arg8[%c0_6, %c0_7], %8 {strides = array<i32>} : memref<64x128xf32, #tpu.memory_space<vmem>>, vector<64x128xf32>,
    %c1_i32 = arith.constant 1 : i32
    %10 = arith.cmpi eq, %arg1, %c1_i32 : i32
    %11 = arith.extui %10 : i1 to i32
    %c0_i32_8 = arith.constant 0 : i32
    %12 = arith.cmpi ne, %11, %c0_i32_8 : i32
    scf.if %12 {
      %c0_9 = arith.constant 0 : index
      %c0_10 = arith.constant 0 : index
      %13 = vector.load %arg5[%c0_9, %c0_10] : memref<64x1xf32, #tpu.memory_space<vmem>>, vector<64x1xf32>
      %c0_11 = arith.constant 0 : index
      %c0_12 = arith.constant 0 : index
      %14 = vector.load %arg8[%c0_11, %c0_12] : memref<64x128xf32, #tpu.memory_space<vmem>>, vector<64x128xf32>
      %c0_13 = arith.constant 0 : index
      %c0_14 = arith.constant 0 : index
      %15 = vector.load %arg4[%c0_13, %c0_14] : memref<64x128xf32, #tpu.memory_space<vmem>>, vector<64x128xf32>
      %16 = arith.addf %14, %15 : vector<64x128xf32>
      %17 = vector.broadcast %13 : vector<64x1xf32> to vector<64x128xf32>
      %18 = arith.mulf %17, %16 : vector<64x128xf32>
      %c0_15 = arith.constant 0 : index
      %c0_16 = arith.constant 0 : index
      %19 = vector.load %arg6[%c0_15, %c0_16] : memref<1x128xf32, #tpu.memory_space<vmem>>, vector<1x128xf32>
      %20 = vector.broadcast %19 : vector<1x128xf32> to vector<64x128xf32>
      %21 = arith.addf %18, %20 : vector<64x128xf32>
      %cst_17 = arith.constant 0.000000e+00 : f32
      %22 = vector.broadcast %cst_17 : f32 to vector<64x128xf32>
      %23 = arith.maximumf %21, %22 : vector<64x128xf32>
      %c0_18 = arith.constant 0 : index
      %c0_19 = arith.constant 0 : index
      %24 = vector.load %arg7[%c0_18, %c0_19] : memref<64x128xf32, #tpu.memory_space<vmem>>, vector<64x128xf32>
      tpu.vector_store %arg7[%c0_18, %c0_19], %23 {strides = array<i32>} : memref<64x128xf32, #tpu.memory_space<vmem>>, vector<64x128xf32>,
    } else {
    }
    return
  }
  func.func @transform_0(%arg0: i32, %arg1: i32) -> (i32, i32) {
    %c0_i32 = arith.constant 0 : i32
    return %arg0, %arg1 : i32, i32
  }
  func.func @transform_1(%arg0: i32, %arg1: i32) -> (i32, i32) {
    %c0_i32 = arith.constant 0 : i32
    %c0_i32_0 = arith.constant 0 : i32
    return %arg1, %c0_i32 : i32, i32
  }
  func.func @transform_2(%arg0: i32, %arg1: i32) -> (i32, i32) {
    %c0_i32 = arith.constant 0 : i32
    %c0_i32_0 = arith.constant 0 : i32
    return %arg0, %c0_i32 : i32, i32
  }
  func.func @transform_3(%arg0: i32, %arg1: i32) -> (i32, i32) {
    %c0_i32 = arith.constant 0 : i32
    %c0_i32_0 = arith.constant 0 : i32
    return %arg0, %c0_i32 : i32, i32
  }
  func.func @transform_4(%arg0: i32, %arg1: i32) -> (i32, i32) {
    %c0_i32 = arith.constant 0 : i32
    %c0_i32_0 = arith.constant 0 : i32
    %c0_i32_1 = arith.constant 0 : i32
    return %c0_i32, %c0_i32_0 : i32, i32
  }
  func.func @transform_5(%arg0: i32, %arg1: i32) -> (i32, i32) {
    %c0_i32 = arith.constant 0 : i32
    %c0_i32_0 = arith.constant 0 : i32
    return %arg0, %c0_i32 : i32, i32
  }
}

</mosaic_0001>

<bundles_post_ra>
// kernel: tpu_custom_call.1
= control target key start
LH: loop header
LB: loop body
LE: loop exit
PB: predicated region body
PF: predicated region fallthrough
CT: control target
= control target key end

     0   :  { %s1770_s0 = inlined_call_operand.vmem [shape: bf16[256,256], index: 0, kind: input, shape index: {}]   ;;  %s1771_s1 = inlined_call_operand.hbm [shape: f32[256,128], index: 1, kind: input, shape index: {}]   ;;  %s1772_s2 = inlined_call_operand.hbm [shape: f32[256,128], index: 2, kind: input, shape index: {}]   ;;  %s1773_s3 = inlined_call_operand.vmem [shape: f32[256,1], index: 3, kind: input, shape index: {}]   ;;  %s1774_s4 = inlined_call_operand.vmem [shape: f32[1,128], index: 4, kind: input, shape index: {}]   ;;  %s1775_s5 = inlined_call_operand.hbm [shape: f32[256,128], index: 5, kind: output, shape index: {}]  }
   0x1   :  { %1786 = sst [smem:[#allocation22_spill]] %s1770_s0 }
   0x2   :  { %1787 = sst [smem:[#allocation23_spill]] %s1771_s1 }
   0x3   :  { %1788 = sst [smem:[#allocation24_spill]] %s1775_s5 }
   0x4   :  { %10 = vsyncpa [#allocation5], 0 }
   0x5   :  { %12 = vsyncpa [#allocation5 + $0x1], 0 }
   0x6   :  { %13 = vsyncpa [#allocation8], 0 }
   0x7   :  { %15 = vsyncpa [#allocation8 + $0x1], 0 }
   0x8   :  { %16 = vsyncpa [#allocation6], 0 }
   0x9   :  { %18 = vsyncpa [#allocation6 + $0x1], 0  ;;  %s1386_s18 = smov 0   ;;  %s1388_s19 = smov 0  }
   0xa   :  { %s1390_s20 = smov 0   ;;  %s1392_s21 = smov 0  }
   0xb   :  { %s1394_s22 = smov 0   ;;  %s1396_s23 = smov 0  }
   0xc   :  { %s1398_s24 = smov 0   ;;  %s1400_s25 = smov 0  }
   0xd   :  { %s1402_s26 = smov 0   ;;  %s1404_s27 = smov 0  }
   0xe   :  { %s1406_s28 = smov 0   ;;  %s1408_s29 = smov 0  }
   0xf   :  { %s1410_s30 = smov 0  }
  0x10 LB: > { %1789 = sst [smem:[#allocation13_spill]] %s1297_s18  ;;  %s856_s6 = sadd.s32 4294967295, %s1345_s30   ;;  %s1345_s30 = sphi %s1410_s30, %s24_s30   ;;  %s1341_s29 = sphi %s1408_s29, %s1830_s29   ;;  %s1337_s28 = sphi %s1406_s28, %s1821_s28   ;;  %s1333_s27 = sphi %s1404_s27, %s1829_s27   ;;  %s1329_s26 = sphi %s1402_s26, %s1820_s26   ;;  %s1325_s25 = sphi %s1400_s25, %s1819_s25   ;;  %s1321_s24 = sphi %s1398_s24, %s1818_s24   ;;  %s1317_s23 = sphi %s1396_s23, %s1828_s23   ;;  %s1313_s22 = sphi %s1394_s22, %s1827_s22   ;;  %s1309_s21 = sphi %s1392_s21, %s1826_s21   ;;  %s1305_s20 = sphi %s1390_s20, %s1825_s20   ;;  %s1301_s19 = sphi %s1388_s19, %s1824_s19   ;;  %s1297_s18 = sphi %s1386_s18, %s1823_s18  }
  0x11   : > { %1790 = sst [smem:[#allocation14_spill]] %s1325_s25  ;;  %s33_s8 = sadd.s32 1, %s1337_s28 }
  0x12   : > { %1791 = sst [smem:[#allocation15_spill]] %s1337_s28  ;;  %s36_s9 = sadd.s32 1, %s1341_s29 }
  0x13   : > { %p34_p0 = scmp.ge.s32.totalorder %s33_s8, 2  ;;  %s45_s10 = sadd.s32 1, %s1325_s25 }
  0x14   : > { %p52_p1 = scmp.ne.s32.totalorder %s1325_s25, %s1321_s24  ;;  %p53_p2 = scmp.eq.s32.totalorder %s1345_s30, 0 }
  0x15   : > { %s1832_s8 = smov (%p34_p0, %s33_s8), 0  ;;  %s1834_s9 = smov (!%p34_p0, %s36_s9), %s1341_s29 }
  0x16   : > { %1792 = sst [smem:[#allocation16_spill]] %s1832_s8  ;;  %s41_s11 = ssub.s32 %s1337_s28, %s1832_s8 }
  0x17   : > { %p1466_p3 = por %p53_p2, %p52_p1  ;;  %p38_p4 = scmp.ge.s32.totalorder %s1834_s9, 4 }
  0x18   : > { %p69_p5 = scmp.eq.s32.totalorder %s41_s11, 0  ;;  %s71_s13 = sadd.s32 1, %s1317_s23 }
  0x19   : > { %p78_p6 = scmp.ne.s32.totalorder %s1317_s23, %s1313_s22  ;;  %s1836_s9 = smov (%p38_p4, %s1834_s9), 0 }
  0x1a   : > { %1794 = sst [smem:[#allocation17_spill]] %s1836_s9  ;;  %s40_s15 = ssub.s32 %s1341_s29, %s1836_s9 }
  0x1b   : > { %s1476_s14 = scalar_select %p69_p5, %s1317_s23, %s71_s13  }
  0x1c   : > { %p1482_p7 = por %p78_p6, %p53_p2  ;;  %s42_s17 = sor.u32 %s41_s11, %s40_s15 }
  0x1d   : > { %1795 = sst [smem:[#allocation18_spill]] %s1476_s14  ;;  %p84_p8 = scmp.ne.s32.totalorder %s1313_s22, %s1309_s21 }
  0x1e   : > { %p43_p9 = scmp.eq.s32.totalorder %s42_s17, 0  ;;  %p85_p10 = scmp.eq.s32.totalorder %s856_s6, 0 }
  0x1f   : > { %p95_p11 = scmp.eq.s32.totalorder %s40_s15, 0  ;;  %s97_s7 = sadd.s32 1, %s1305_s20 }
  0x20   : > { %s1492_s8 = scalar_select %p43_p9, %s1325_s25, %s45_s10  }
  0x21   : > { %p1494_p12 = por %p85_p10, %p84_p8  ;;  %p104_p13 = scmp.ne.s32.totalorder %s1305_s20, %s1301_s19 }
  0x22   : > { %1797 = sst [smem:[#allocation19_spill]] %s1492_s8  ;;  %p110_p1 = scmp.ne.s32.totalorder %s1301_s19, %s1297_s18 }
  0x23   : > { %s1798_s5 = scalar_select %p1494_p12, 1, 0 }
  0x24   : > { %s1501_s13 = scalar_select %p95_p11, %s1305_s20, %s97_s7  }
  0x25   : > { %p1505_p0 = por %p104_p13, %p53_p2  ;;  %p181_p4 = scmp.eq.s32.totalorder %s856_s6, 7 }
  0x26   : > { %1799 = sst [smem:[#allocation20_spill]] %s1501_s13  ;;  %s1801_s21 = sadd.s32 4294967294, %s1345_s30  }
  0x27   : > { %p187_p5 = scmp.eq.s32.totalorder %s1801_s21, 7  ;;  %p1515_p6 = por %p110_p1, %p85_p10 }
  0x28   : > { %p1519_p8 = por %p181_p4, %p104_p13  ;;  %p859_p2 = scmp.ge.s32.totalorder %s1345_s30, 8 }
  0x29   : > { %s1802_s10 = scalar_select %p1515_p6, 1, 0 }
  0x2a   : > { %s1803_s11 = scalar_select %p1519_p8, 1, 0 }
  0x2b   : > { %p1523_p9 = por %p187_p5, %p110_p1  ;;  %206 = sbr.rel (%p859_p2) target bundleno = 120 (0x78), region = 20 }
  0x2d   : > { %s1804_s7 = scalar_select %p1523_p9, 1, 0 }
  0x2f   : > { %1805 = sst [smem:[#allocation21_spill]] %s1804_s7 }
  0x32   : > { %209 = sbr.rel (!%p1466_p3) target bundleno = 65 (0x41), region = 24  ;;  %s211_s6 = sand.u32 (%p1466_p3), 1, %s1325_s25  }
  0x33   : > { %s885_s15 = sshll.u32 (%p1466_p3), %s1341_s29, 4  ;;  %s860_s17 = sshll.u32 (%p1466_p3), %s211_s6, 5 }
  0x34   : > { %s216_s21 = sadd.s32 (%p1466_p3), %s1337_s28, %s885_s15  ;;  %s1806_s0 = sld [smem:[#allocation22_spill]] (%p1466_p3) }
  0x35   : > { %s863_s8 = sshll.u32 (%p1466_p3), %s216_s21, 2  ;;  %s213_s7 = scalar_lea.vmem (%p1466_p3), [#allocation3], %s860_s17 }
  0x3a   : > { %s218_s18 = scalar_lea.vmem %s1806_s0, %s863_s8 }
  0x3b   : > { %v234_v0 = vld [vmem:[%s218_s18] sm:$0xf]  ;;  %v236_v1 = vld [vmem:[%s218_s18 + $0x8] sm:$0xf]  ;;  %v238_v2 = vld [vmem:[%s218_s18 + $0x10] sm:$0xf] }
  0x3c   : > { %235 = vst [vmem:[%s213_s7] sm:$0xf] %v234_v0  ;;  %237 = vst [vmem:[%s213_s7 + $0x4] sm:$0xf] %v236_v1  ;;  %v240_v3 = vld [vmem:[%s218_s18 + $0x18] sm:$0xf] }
  0x3d   : > { %239 = vst [vmem:[%s213_s7 + $0x8] sm:$0xf] %v238_v2  ;;  %v242_v4 = vld [vmem:[%s218_s18 + $0x20] sm:$0xf]  ;;  %v244_v5 = vld [vmem:[%s218_s18 + $0x28] sm:$0xf] }
  0x3e   : > { %241 = vst [vmem:[%s213_s7 + $0xc] sm:$0xf] %v240_v3  ;;  %243 = vst [vmem:[%s213_s7 + $0x10] sm:$0xf] %v242_v4  ;;  %v246_v6 = vld [vmem:[%s218_s18 + $0x30] sm:$0xf] }
  0x3f   : > { %245 = vst [vmem:[%s213_s7 + $0x14] sm:$0xf] %v244_v5  ;;  %v248_v7 = vld [vmem:[%s218_s18 + $0x38] sm:$0xf]  ;;  %247 = vst [vmem:[%s213_s7 + $0x18] sm:$0xf] %v246_v6 }
  0x40   : > { %249 = vst [vmem:[%s213_s7 + $0x1c] sm:$0xf] %v248_v7 }
  0x41 PF: > { %s289_s8 = sand.u32 1, %s1317_s23   ;;  %s886_s12 = sshll.u32 %s1337_s28, 11 }
  0x42   : > { %s864_s14 = sshll.u32 %s289_s8, 7  ;;  %s1807_s1 = sld [smem:[#allocation23_spill]] }
  0x43   : > { %s293_s17 = scalar_lea.vmem [#allocation4], %s864_s14  ;;  %s1545_s7 = scalar_lea.sflag [#allocation5], %s289_s8 }
  0x44   : > { %s300_s18 = sshll.u32 %s293_s17, 4  ;;  %s1543_s18 = int_to_ptr.vmem [resolvable:$true] %s300_s18 }
  0x48   : > { %s1541_s15 = scalar_lea.hbm %s1807_s1, %s886_s12  ;;  %s1151_s12 = scalar_lea.hbm %s1807_s1, 4096 }
  0x49   : > { %s1147_s21 = scalar_lea.hbm %s1541_s15, 2048  ;;  %p1152_p13 = scmp.lt.u32.totalorder %s1541_s15, %s1807_s1 }
  0x4a   : > { %p1148_p3 = scmp.ne.s32.totalorder %s1541_s15, %s1147_s21  ;;  %p1153_p1 = scmp.lt.u32.totalorder %s1151_s12, %s1147_s21 }
  0x4b   : > { %p1155_p5 = scmp.lt.u32.totalorder %s1147_s21, %s1541_s15 }
  0x4c   : > { %p1149_p10 = pnand %p1148_p3, %p1482_p7  ;;  %p1154_p4 = por %p1153_p1, %p1152_p13 }
  0x4e   : > { %p1150_p11 = pneg %p1149_p10  ;;  %p1156_p2 = por %p1155_p5, %p1154_p4 }
  0x50   : > { %p1157_p9 = pnand %p1156_p2, %p1150_p11 }
  0x52   : > { %1160 = shalt.err (!%p1157_p9)
}
  0x53   : > { %s1161_s8 = scalar_lea.vmem %s1543_s18, 2048  ;;  %s1347_s0 = smov [#allocation4]  }
  0x54   : > { %p1162_p3 = scmp.ne.s32.totalorder %s1543_s18, %s1161_s8  ;;  %s1165_s28 = sshll.u32 %s1347_s0, 4  ;;  %s1166_s28 = int_to_ptr.vmem [resolvable:$false] %s1165_s28 }
  0x55   : > { %s1167_s14 = scalar_lea.vmem %s1166_s28, 4096  ;;  %p1168_p6 = scmp.lt.s32.totalorder %s1543_s18, %s1166_s28 }
  0x56   : > { %p1163_p10 = pnand %p1162_p3, %p1482_p7  ;;  %p1169_p12 = scmp.lt.s32.totalorder %s1167_s14, %s1161_s8 }
  0x58   : > { %p1164_p8 = pneg %p1163_p10  ;;  %p1170_p13 = por %p1169_p12, %p1168_p6 }
  0x5a   : > { %p1171_p1 = pnand %p1170_p13, %p1164_p8 }
  0x5c   : > { %1174 = shalt.err (!%p1171_p1)
}
  0x5d   : > { %s1348_s17 = smov 128   ;;  %s1349_s21 = smov 8  }
  0x5e   : > { %1024 = dma.hbm_to_vmem [thread:$0]  (%p1482_p7), %s1541_s15, 2048, %s1543_s18, %s1545_s7, %s1348_s17, %s1348_s17, %s1349_s21  }
  0x5f   : > { %s310_s12 = sand.u32 1, %s1305_s20   ;;  %s887_s13 = sshll.u32 %s1341_s29, 10 }
  0x60   : > { %s867_s6 = sshll.u32 %s310_s12, 6  ;;  %s1577_s28 = scalar_lea.hbm %s1772_s2, %s887_s13 }
  0x61   : > { %s314_s14 = scalar_lea.vmem [#allocation7], %s867_s6  ;;  %s1581_s16 = scalar_lea.sflag [#allocation8], %s310_s12 }
  0x62   : > { %s321_s1 = sshll.u32 %s314_s14, 4  ;;  %s1175_s25 = scalar_lea.hbm %s1577_s28, 1024  ;;  %s1579_s1 = int_to_ptr.vmem [resolvable:$true] %s321_s1 }
  0x63   : > { %p1176_p7 = scmp.ne.s32.totalorder %s1577_s28, %s1175_s25  ;;  %s1179_s7 = scalar_lea.hbm %s1772_s2, 4096 }
  0x64   : > { %p1180_p8 = scmp.lt.u32.totalorder %s1577_s28, %s1772_s2  ;;  %p1181_p9 = scmp.lt.u32.totalorder %s1179_s7, %s1175_s25 }
  0x65   : > { %p1177_p12 = pnand %p1176_p7, %p1505_p0  ;;  %p1183_p4 = scmp.lt.u32.totalorder %s1175_s25, %s1577_s28 }
  0x66   : > { %p1182_p11 = por %p1181_p9, %p1180_p8 }
  0x67   : > { %p1178_p6 = pneg %p1177_p12 }
  0x68   : > { %p1184_p5 = por %p1183_p4, %p1182_p11 }
  0x6a   : > { %p1185_p2 = pnand %p1184_p5, %p1178_p6 }
  0x6c   : > { %1188 = shalt.err (!%p1185_p2)
}
  0x6d   : > { %s1189_s12 = scalar_lea.vmem %s1579_s1, 1024  ;;  %s1350_s6 = smov [#allocation7]  }
  0x6e   : > { %p1190_p3 = scmp.ne.s32.totalorder %s1579_s1, %s1189_s12  ;;  %s1193_s0 = sshll.u32 %s1350_s6, 4  ;;  %s1194_s0 = int_to_ptr.vmem [resolvable:$false] %s1193_s0 }
  0x6f   : > { %s1195_s14 = scalar_lea.vmem %s1194_s0, 2048  ;;  %p1196_p1 = scmp.lt.s32.totalorder %s1579_s1, %s1194_s0 }
  0x70   : > { %p1191_p10 = pnand %p1190_p3, %p1505_p0  ;;  %p1197_p7 = scmp.lt.s32.totalorder %s1195_s14, %s1189_s12 }
  0x72   : > { %p1192_p13 = pneg %p1191_p10  ;;  %p1198_p12 = por %p1197_p7, %p1196_p1 }
  0x74   : > { %p1199_p8 = pnand %p1198_p12, %p1192_p13 }
  0x76   : > { %1202 = shalt.err (!%p1199_p8)
}
  0x77   : > { %1025 = dma.hbm_to_vmem [thread:$0]  (%p1505_p0), %s1577_s28, 1024, %s1579_s1, %s1581_s16, %s1348_s17, %s1348_s17, %s1349_s21  }
  0x78 PF: > { %p870_p6 = scmp.ge.s32.totalorder %s1345_s30, 1  ;;  %p338_p9 = scmp.lt.s32.totalorder %s1345_s30, 9 }
  0x7a   : > { %p339_p11 = pnand %p870_p6, %p338_p9 }
  0x7b   : > { %s345_s25 = sand.u32 (!%p339_p11), 1, %s1321_s24   ;;  %s351_s15 = sand.u32 (!%p339_p11), 1, %s1313_s22  }
  0x7c   : > { %342 = sbr.rel (%p339_p11) target bundleno = 445 (0x1bd), region = 77  ;;  %s871_s9 = sshll.u32 (!%p339_p11), %s345_s25, 5 }
  0x7d   : > { %s872_s18 = sshll.u32 (!%p339_p11), %s351_s15, 7  ;;  %s1612_s7 = scalar_lea.vmem (!%p339_p11), [#allocation3], %s871_s9 }
  0x7e   : > { %s352_s13 = scalar_lea.sflag (!%p339_p11), [#allocation5], %s351_s15  ;;  %s1614_s8 = scalar_lea.vmem (!%p339_p11), [#allocation4], %s872_s18 }
  0x7f   : > { %p1808_p0 = scmp.ne.s32.totalorder (!%p339_p11), %s1798_s5, 0 }
  0x83   : > { %1284 = dma.done.wait (%p1808_p0), %s352_s13, 2048  }
  0x84   : > { %1286 = vsyncadd (%p1808_p0), %s352_s13, 4294965248  ;;  %s1621_s1 = sand.u32 1, %s1301_s19   ;;  %p1809_p4 = scmp.ne.s32.totalorder %s1802_s10, 0 }
  0x85   : > { %s873_s24 = sshll.u32 %s1621_s1, 6  ;;  %s361_s17 = scalar_lea.sflag [#allocation8], %s1621_s1 }
  0x86   : > { %s1625_s21 = scalar_lea.vmem [#allocation7], %s873_s24 }
  0x87   : > { %1288 = dma.done.wait (%p1809_p4), %s361_s17, 1024  }
  0x88   : > { %1290 = vsyncadd (%p1809_p4), %s361_s17, 4294966272  ;;  %s875_s28 = sshll.u32 %s1333_s27, 3  ;;  %s1637_s0 = scalar_lea.vmem [#allocation9], %s873_s24 }
  0x89   : > { %p409_p5 = scmp.lt.s32.totalorder %s875_s28, 31  ;;  %p877_p2 = scmp.ne.s32.totalorder %s1329_s26, 0 }
  0x8a   : > { %v1351_v8 = vmov (!%p877_p2), 0.0  }
  0x8b   : > { %s1838_s28 = smov (!%p409_p5, %s875_s28), 31  ;;  %418 = sbr.rel (%p877_p2) target bundleno = 146 (0x92), region = 93 }
  0x8c   : > { %s876_s5 = sshll.u32 %s1838_s28, 3  ;;  %419 = vst [vmem:[#allocation2] sm:$0xff] (!%p877_p2), %v1351_v8  ;;  %420 = vst [vmem:[#allocation2 + $0x8] sm:$0xff] (!%p877_p2), %v1351_v8 }
  0x8d   : > { %s1635_s6 = scalar_lea.vmem %s1773_s3, %s876_s5  ;;  %421 = vst [vmem:[#allocation2 + $0x10] sm:$0xff] (!%p877_p2), %v1351_v8  ;;  %422 = vst [vmem:[#allocation2 + $0x18] sm:$0xff] (!%p877_p2), %v1351_v8 }
  0x8e   : > { %423 = vst [vmem:[#allocation2 + $0x20] sm:$0xff] (!%p877_p2), %v1351_v8  ;;  %424 = vst [vmem:[#allocation2 + $0x28] sm:$0xff] (!%p877_p2), %v1351_v8 }
  0x8f   : > { %425 = vst [vmem:[#allocation2 + $0x30] sm:$0xff] (!%p877_p2), %v1351_v8  ;;  %426 = vst [vmem:[#allocation2 + $0x38] sm:$0xff] (!%p877_p2), %v1351_v8 }
  0x92 PF: > { %v451_v9 = vld [vmem:[%s1614_s8] sm:$0xff]  ;;  %v452_v10 = vld [vmem:[%s1614_s8 + $0x8] sm:$0xff]  ;;  %v453_v11 = vld [vmem:[%s1614_s8 + $0x10] sm:$0xff]  ;;  %p878_p3 = scmp.ne.s32.totalorder %s1329_s26, 1 }
  0x93   : > { %v976_v12 = vpack.c.bf16 %v452_v10, %v451_v9  ;;  %v454_v13 = vld [vmem:[%s1614_s8 + $0x18] sm:$0xff]  ;;  %v455_v15 = vld [vmem:[%s1614_s8 + $0x20] sm:$0xff]  ;;  %v456_v16 = vld [vmem:[%s1614_s8 + $0x28] sm:$0xff]  ;;  %v1352_v7 = vmov (!%p878_p3), 0  }
  0x94   : > { %v980_v14 = vpack.c.bf16 %v454_v13, %v453_v11  ;;  %v984_v17 = vpack.c.bf16 %v456_v16, %v455_v15  ;;  %v890_v18 = vld [vmem:[%s1612_s7] sm:$0xff]   ;;  %v906_v19 = vld [vmem:[%s1612_s7 + $0x10] sm:$0xff]   ;;  %v458_v21 = vld [vmem:[%s1614_s8 + $0x38] sm:$0xff]  ;;  %1146 = vset.pattern.permute.xlu1 (!%p878_p3), %v1352_v7  ;;  %1145 = vset.pattern.permute.xlu0 (!%p878_p3), %v1352_v7 }
  0x95   : > { %977 = vmatprep.subr.bf16.mxu0 %v976_v12  ;;  %1008 = vmatprep.subr.bf16.mxu1 %v976_v12  ;;  %v457_v20 = vld [vmem:[%s1614_s8 + $0x30] sm:$0xff]  ;;  %v891_v22 = vunpack.c.l.bf16 %v890_v18  ;;  %v899_v23 = vunpack.c.l.bf16 %v906_v19  ;;  %v459_v25 = vld [vmem:[%s1614_s8 + $0x40] sm:$0xff]  ;;  %v460_v26 = vld [vmem:[%s1614_s8 + $0x48] sm:$0xff]  ;;  %v892_v39 = vunpack.c.h.bf16 %v890_v18  ;;  %v900_v40 = vunpack.c.h.bf16 %v906_v19 }
  0x96   : > { %979 = vmatpush3.bf16.msra.mxu0 %v976_v12  ;;  %1016 = vmatpush3.bf16.msra.mxu1 %v976_v12  ;;  %v988_v24 = vpack.c.bf16 %v458_v21, %v457_v20  ;;  %v992_v27 = vpack.c.bf16 %v460_v26, %v459_v25  ;;  %v461_v28 = vld [vmem:[%s1614_s8 + $0x50] sm:$0xff]  ;;  %v462_v29 = vld [vmem:[%s1614_s8 + $0x58] sm:$0xff]  ;;  %v463_v31 = vld [vmem:[%s1614_s8 + $0x60] sm:$0xff] }
  0x97   : > { %981 = vmatprep.subr.bf16.mxu0 %v980_v14  ;;  %1009 = vmatprep.subr.bf16.mxu1 %v980_v14  ;;  %v996_v30 = vpack.c.bf16 %v462_v29, %v461_v28  ;;  %v464_v32 = vld [vmem:[%s1614_s8 + $0x68] sm:$0xff]  ;;  %v465_v34 = vld [vmem:[%s1614_s8 + $0x70] sm:$0xff]  ;;  %v466_v35 = vld [vmem:[%s1614_s8 + $0x78] sm:$0xff] }
  0x98   : > { %964 = vmatprep.mubr.f32.mxu0 %v891_v22  ;;  %970 = vmatprep.mubr.f32.mxu1 %v899_v23  ;;  %v1000_v33 = vpack.c.bf16 %v464_v32, %v463_v31  ;;  %v1004_v36 = vpack.c.bf16 %v466_v35, %v465_v34  ;;  %v905_v37 = vld [vmem:[%s1612_s7 + $0x8] sm:$0xff]   ;;  %v907_v38 = vld [vmem:[%s1612_s7 + $0x18] sm:$0xff]   ;;  %v443_v47 = vld [vmem:[#allocation2] sm:$0xff] }
  0x99   : > { %v895_v41 = vunpack.c.l.bf16 %v905_v37  ;;  %v903_v42 = vunpack.c.l.bf16 %v907_v38  ;;  %v896_v43 = vunpack.c.h.bf16 %v905_v37  ;;  %v904_v44 = vunpack.c.h.bf16 %v907_v38  ;;  %v444_v45 = vld [vmem:[#allocation2 + $0x8] sm:$0xff]  ;;  %v447_v48 = vld [vmem:[#allocation2 + $0x20] sm:$0xff]  ;;  %v446_v57 = vld [vmem:[#allocation2 + $0x18] sm:$0xff] }
  0x9a   : > { %983 = vmatpush3.bf16.msra.mxu0 %v980_v14  ;;  %1017 = vmatpush3.bf16.msra.mxu1 %v980_v14  ;;  %v448_v46 = vld [vmem:[#allocation2 + $0x28] sm:$0xff]  ;;  %v450_v58 = vld [vmem:[#allocation2 + $0x38] sm:$0xff]  ;;  %v445_v59 = vld [vmem:[#allocation2 + $0x10] sm:$0xff] }
  0x9b   : > { %985 = vmatprep.subr.bf16.mxu0 %v984_v17  ;;  %1010 = vmatprep.subr.bf16.mxu1 %v984_v17  ;;  %v449_v60 = vld [vmem:[#allocation2 + $0x30] sm:$0xff]  ;;  %v592_v6 = vld [vmem:[%s1635_s6] sm:$0xff] (!%p878_p3)  ;;  %v595_v8 = vld [vmem:[%s1635_s6 + $0x18] sm:$0xff] (!%p878_p3) }
  0x9c   : > { %v594_v5 = vld [vmem:[%s1635_s6 + $0x10] sm:$0xff] (!%p878_p3)  ;;  %626 = vperm.xlu0 (!%p878_p3), %1145, %v592_v6   ;;  %v593_v9 = vld [vmem:[%s1635_s6 + $0x8] sm:$0xff] (!%p878_p3)  ;;  %v596_v11 = vld [vmem:[%s1635_s6 + $0x20] sm:$0xff] (!%p878_p3) }
  0x9d   : > { %636 = vperm.xlu1 (!%p878_p3), %1146, %v594_v5   ;;  %v597_v10 = vld [vmem:[%s1635_s6 + $0x28] sm:$0xff] (!%p878_p3)  ;;  %v599_v12 = vld [vmem:[%s1635_s6 + $0x38] sm:$0xff] (!%p878_p3)  ;;  %v598_v13 = vld [vmem:[%s1635_s6 + $0x30] sm:$0xff] (!%p878_p3) }
  0x9e   : > { %987 = vmatpush3.bf16.msra.mxu0 %v984_v17  ;;  %1018 = vmatpush3.bf16.msra.mxu1 %v984_v17  ;;  %v610_v15 = vld [vmem:[%s1625_s21 + $0x10] sm:$0xff] (!%p878_p3)  ;;  %v608_v17 = vld [vmem:[%s1625_s21] sm:$0xff] (!%p878_p3)  ;;  %v611_v21 = vld [vmem:[%s1625_s21 + $0x18] sm:$0xff] (!%p878_p3) }
  0x9f   : > { %989 = vmatprep.subr.bf16.mxu0 %v988_v24  ;;  %1011 = vmatprep.subr.bf16.mxu1 %v988_v24  ;;  %v609_v23 = vld [vmem:[%s1625_s21 + $0x8] sm:$0xff] (!%p878_p3)  ;;  %v612_v34 = vld [vmem:[%s1625_s21 + $0x20] sm:$0xff] (!%p878_p3) }
  0xa0   : > { %631 = vperm.xlu0 (!%p878_p3), %1145, %v593_v9   ;;  %v613_v32 = vld [vmem:[%s1625_s21 + $0x28] sm:$0xff] (!%p878_p3) }
  0xa1   : > { %641 = vperm.xlu1 (!%p878_p3), %1146, %v595_v8  }
  0xa2   : > { %991 = vmatpush3.bf16.msra.mxu0 %v988_v24  ;;  %1019 = vmatpush3.bf16.msra.mxu1 %v988_v24  ;;  %v879_v24 = vld [vmem:[%s1774_s4] ss:$0 sm:$0xff] (!%p878_p3) }
  0xa3   : > { %993 = vmatprep.subr.bf16.mxu0 %v992_v27  ;;  %1012 = vmatprep.subr.bf16.mxu1 %v992_v27 }
  0xa4   : > { %646 = vperm.xlu0 (!%p878_p3), %1145, %v596_v11  }
  0xa5   : > { %651 = vperm.xlu1 (!%p878_p3), %1146, %v597_v10  }
  0xa6   : > { %995 = vmatpush3.bf16.msra.mxu0 %v992_v27  ;;  %1020 = vmatpush3.bf16.msra.mxu1 %v992_v27 }
  0xa7   : > { %997 = vmatprep.subr.bf16.mxu0 %v996_v30  ;;  %1013 = vmatprep.subr.bf16.mxu1 %v996_v30 }
  0xa8   : > { %656 = vperm.xlu0 (!%p878_p3), %1145, %v598_v13  }
  0xa9   : > { %661 = vperm.xlu1 (!%p878_p3), %1146, %v599_v12  }
  0xaa   : > { %999 = vmatpush3.bf16.msra.mxu0 %v996_v30  ;;  %1021 = vmatpush3.bf16.msra.mxu1 %v996_v30 }
  0xab   : > { %1001 = vmatprep.subr.bf16.mxu0 %v1000_v33  ;;  %1014 = vmatprep.subr.bf16.mxu1 %v1000_v33 }
  0xae   : > { %1003 = vmatpush3.bf16.msra.mxu0 %v1000_v33  ;;  %1022 = vmatpush3.bf16.msra.mxu1 %v1000_v33 }
  0xaf   : > { %1005 = vmatprep.subr.bf16.mxu0 %v1004_v36  ;;  %1015 = vmatprep.subr.bf16.mxu1 %v1004_v36 }
  0xb2   : > { %1007 = vmatpush3.bf16.msra.mxu0 %v1004_v36  ;;  %1023 = vmatpush3.bf16.msra.mxu1 %v1004_v36 }
  0xb5   : > { %965 = vmatmul.mubr.f32.vlgmr.msra.gmra.mrb[0].mxu0 %v892_v39  ;;  %971 = vmatmul.mubr.f32.vlgmr.msra.gmra.mrb[0].mxu1 %v900_v40 }
  0xb6   : > { %967 = vmatprep.mubr.f32.mxu0 %v895_v41  ;;  %973 = vmatprep.mubr.f32.mxu1 %v903_v42 }
  0xb9   : > { %968 = vmatmul.mubr.f32.gmra.mrb[2].mxu0 %v896_v43  ;;  %974 = vmatmul.mubr.f32.gmra.mrb[2].mxu1 %v904_v44 }
 0x11b   : > { %v627_v26 = vpop.permute.xlu0 (!%p878_p3), %626 }
 0x11c   : > { %v637_v25 = vpop.permute.xlu1 (!%p878_p3), %636 }
 0x11f   : > { %v632_v38 = vpop.permute.xlu0 (!%p878_p3), %631 }
 0x120   : > { %v642_v37 = vpop.permute.xlu1 (!%p878_p3), %641 }
 0x188   : > { %v966_v49 = vpop.f32.mrb[0].mxu0  ;;  %v972_v50 = vpop.f32.mrb[0].mxu1 }
 0x189   : > { %v573_v51 = vadd.f32 %v966_v49, %v444_v45  ;;  %v577_v52 = vadd.f32 %v972_v50, %v448_v46  ;;  %v533_v53 = vpop.f32.mrb[1].mxu0  ;;  %v553_v54 = vpop.f32.mrb[1].mxu1  ;;  %v615_v46 = vld [vmem:[%s1625_s21 + $0x38] sm:$0xff] (!%p878_p3) }
 0x18a   : > { %v572_v55 = vadd.f32 %v533_v53, %v443_v47  ;;  %v576_v56 = vadd.f32 %v553_v54, %v447_v48  ;;  %591 = sbr.rel (%p878_p3) target bundleno = 418 (0x1a2), region = 97  ;;  %v614_v48 = vld [vmem:[%s1625_s21 + $0x30] sm:$0xff] (!%p878_p3) }
 0x18b   : > { %581 = vst [vmem:[#allocation2 + $0x8] sm:$0xff] %v573_v51  ;;  %585 = vst [vmem:[#allocation2 + $0x28] sm:$0xff] %v577_v52  ;;  %v652_v51 = vpop.permute.xlu1 (!%p878_p3), %651  ;;  %v647_v52 = vpop.permute.xlu0 (!%p878_p3), %646 }
 0x18c   : > { %580 = vst [vmem:[#allocation2] sm:$0xff] %v572_v55  ;;  %584 = vst [vmem:[#allocation2 + $0x20] sm:$0xff] %v576_v56  ;;  %v969_v61 = vpop.f32.mrb[2].mxu0  ;;  %v975_v62 = vpop.f32.mrb[2].mxu1 }
 0x18d   : > { %v575_v63 = vadd.f32 %v969_v61, %v446_v57  ;;  %v579_v0 = vadd.f32 %v975_v62, %v450_v58  ;;  %v543_v1 = vpop.f32.mrb[3].mxu0  ;;  %v563_v2 = vpop.f32.mrb[3].mxu1 }
 0x18e   : > { %v574_v3 = vadd.f32 %v543_v1, %v445_v59  ;;  %v578_v4 = vadd.f32 %v563_v2, %v449_v60 }
 0x18f   : > { %583 = vst [vmem:[#allocation2 + $0x18] sm:$0xff] %v575_v63  ;;  %587 = vst [vmem:[#allocation2 + $0x38] sm:$0xff] %v579_v0  ;;  %v662_v61 = vpop.permute.xlu1 (!%p878_p3), %661  ;;  %v657_v62 = vpop.permute.xlu0 (!%p878_p3), %656 }
 0x190   : > { %582 = vst [vmem:[#allocation2 + $0x10] sm:$0xff] %v574_v3  ;;  %586 = vst [vmem:[#allocation2 + $0x30] sm:$0xff] %v578_v4 }
 0x192   : > { %v601_v22 = vld [vmem:[#allocation2 + $0x8] sm:$0xff] }
 0x193   : > { %v600_v16 = vld [vmem:[#allocation2] sm:$0xff]  ;;  %v605_v27 = vld [vmem:[#allocation2 + $0x28] sm:$0xff]  ;;  %v617_v31 = vadd.f32 %v609_v23, %v601_v22 }
 0x194   : > { %v616_v19 = vadd.f32 %v608_v17, %v600_v16  ;;  %v604_v33 = vld [vmem:[#allocation2 + $0x20] sm:$0xff]  ;;  %v621_v39 = vadd.f32 %v613_v32, %v605_v27 }
 0x195   : > { %v620_v40 = vadd.f32 %v612_v34, %v604_v33  ;;  %v665_v45 = vmul.f32 %v632_v38, %v617_v31 }
 0x196   : > { %v603_v20 = vld [vmem:[#allocation2 + $0x18] sm:$0xff]  ;;  %v664_v29 = vmul.f32 %v627_v26, %v616_v19  ;;  %v669_v57 = vmul.f32 %v652_v51, %v621_v39 }
 0x197   : > { %v602_v14 = vld [vmem:[#allocation2 + $0x10] sm:$0xff]  ;;  %v619_v30 = vadd.f32 %v611_v21, %v603_v20  ;;  %v607_v41 = vld [vmem:[#allocation2 + $0x38] sm:$0xff]  ;;  %v680_v50 = vadd.f32 %v879_v24, %v665_v45  ;;  %v668_v58 = vmul.f32 %v647_v52, %v620_v40 }
 0x198   : > { %v618_v18 = vadd.f32 %v610_v15, %v602_v14  ;;  %v679_v36 = vadd.f32 %v879_v24, %v664_v29  ;;  %v606_v47 = vld [vmem:[#allocation2 + $0x30] sm:$0xff]  ;;  %v623_v53 = vadd.f32 %v615_v46, %v607_v41  ;;  %v684_v59 = vadd.f32 %v879_v24, %v669_v57 }
 0x199   : > { %v667_v44 = vmul.f32 %v642_v37, %v619_v30  ;;  %v622_v54 = vadd.f32 %v614_v48, %v606_v47  ;;  %v688_v56 = vmax.f32 %v680_v50, 0.0  ;;  %v683_v60 = vadd.f32 %v879_v24, %v668_v58 }
 0x19a   : > { %v666_v28 = vmul.f32 %v637_v25, %v618_v18  ;;  %v687_v43 = vmax.f32 %v679_v36, 0.0  ;;  %v692_v63 = vmax.f32 %v684_v59, 0.0  ;;  %v671_v1 = vmul.f32 %v662_v61, %v623_v53 }
 0x19b   : > { %v682_v49 = vadd.f32 %v879_v24, %v667_v44  ;;  %696 = vst [vmem:[%s1637_s0 + $0x8] sm:$0xff] %v688_v56  ;;  %v691_v0 = vmax.f32 %v683_v60, 0.0  ;;  %v670_v2 = vmul.f32 %v657_v62, %v622_v54 }
 0x19c   : > { %v681_v35 = vadd.f32 %v879_v24, %v666_v28  ;;  %695 = vst [vmem:[%s1637_s0] sm:$0xff] %v687_v43  ;;  %700 = vst [vmem:[%s1637_s0 + $0x28] sm:$0xff] %v692_v63  ;;  %v686_v3 = vadd.f32 %v879_v24, %v671_v1 }
 0x19d   : > { %v690_v55 = vmax.f32 %v682_v49, 0.0  ;;  %699 = vst [vmem:[%s1637_s0 + $0x20] sm:$0xff] %v691_v0  ;;  %v685_v4 = vadd.f32 %v879_v24, %v670_v2 }
 0x19e   : > { %v689_v42 = vmax.f32 %v681_v35, 0.0  ;;  %v694_v5 = vmax.f32 %v686_v3, 0.0 }
 0x19f   : > { %698 = vst [vmem:[%s1637_s0 + $0x18] sm:$0xff] %v690_v55  ;;  %v693_v6 = vmax.f32 %v685_v4, 0.0 }
 0x1a0   : > { %697 = vst [vmem:[%s1637_s0 + $0x10] sm:$0xff] %v689_v42  ;;  %702 = vst [vmem:[%s1637_s0 + $0x38] sm:$0xff] %v694_v5 }
 0x1a1   : > { %701 = vst [vmem:[%s1637_s0 + $0x30] sm:$0xff] %v693_v6 }
 0x1a2 PF: > { %s888_s14 = sshll.u32 %s1333_s27, 10  ;;  %s1810_s9 = sld [smem:[#allocation24_spill]] }
 0x1a3   : > { %s717_s7 = sshll.u32 %s1637_s0, 4  ;;  %s704_s13 = scalar_lea.sflag [#allocation6], %s1621_s1  ;;  %s1695_s7 = int_to_ptr.vmem [resolvable:$true] %s717_s7 }
 0x1a4   : > { %s1203_s8 = scalar_lea.vmem %s1695_s7, 1024  ;;  %p1811_p13 = scmp.ne.s32.totalorder %s1803_s11, 0 }
 0x1a5   : > { %p1204_p10 = scmp.ne.s32.totalorder %s1695_s7, %s1203_s8  ;;  %s1353_s24 = smov [#allocation9]  }
 0x1a6   : > { %s1207_s17 = sshll.u32 %s1353_s24, 4  ;;  %s1208_s17 = int_to_ptr.vmem [resolvable:$false] %s1207_s17 }
 0x1a7   : > { %p1205_p1 = pnand %p1204_p10, %p1811_p13  ;;  %s1209_s27 = scalar_lea.vmem %s1208_s17, 2048 }
 0x1a8   : > { %s1692_s18 = scalar_lea.hbm %s1810_s9, %s888_s14  ;;  %p1210_p12 = scmp.lt.s32.totalorder %s1695_s7, %s1208_s17 }
 0x1a9   : > { %p1206_p7 = pneg %p1205_p1  ;;  %p1211_p8 = scmp.lt.s32.totalorder %s1209_s27, %s1203_s8 }
 0x1ab   : > { %p1212_p6 = por %p1211_p8, %p1210_p12 }
 0x1ad   : > { %p1213_p9 = pnand %p1212_p6, %p1206_p7 }
 0x1af   : > { %1216 = shalt.err (!%p1213_p9)
}
 0x1b0   : > { %s1217_s21 = scalar_lea.hbm %s1692_s18, 1024  ;;  %s1221_s16 = scalar_lea.hbm %s1810_s9, 4096 }
 0x1b1   : > { %p1218_p11 = scmp.ne.s32.totalorder %s1692_s18, %s1217_s21  ;;  %p1222_p5 = scmp.lt.u32.totalorder %s1692_s18, %s1810_s9 }
 0x1b2   : > { %p1223_p2 = scmp.lt.u32.totalorder %s1221_s16, %s1217_s21  ;;  %p1225_p10 = scmp.lt.u32.totalorder %s1217_s21, %s1692_s18 }
 0x1b3   : > { %p1219_p0 = pnand %p1218_p11, %p1811_p13 }
 0x1b4   : > { %p1224_p3 = por %p1223_p2, %p1222_p5 }
 0x1b5   : > { %p1220_p4 = pneg %p1219_p0 }
 0x1b6   : > { %p1226_p1 = por %p1225_p10, %p1224_p3 }
 0x1b8   : > { %p1227_p7 = pnand %p1226_p1, %p1220_p4 }
 0x1ba   : > { %1230 = shalt.err (!%p1227_p7)
}
 0x1bb   : > { %s1354_s0 = smov 128   ;;  %s1355_s26 = smov 8  }
 0x1bc   : > { %1028 = dma.vmem_to_hbm [thread:$0]  (%p1811_p13), %s1695_s7, 1024, %s1692_s18, %s704_s13, %s1354_s0, %s1354_s0, %s1355_s26  }
 0x1bd PF: > { %s1812_s10 = sld [smem:[#allocation13_spill]]  ;;  %s1813_s14 = sld [smem:[#allocation21_spill]] }
 0x1be   : > { %p1034_p12 = scmp.ge.s32.totalorder %s1345_s30, 2 }
 0x1c3   : > { %s732_s25 = sand.u32 1, %s1812_s10   ;;  %p1814_p8 = scmp.ne.s32.totalorder %s1813_s14, 0 }
 0x1c4   : > { %s733_s15 = scalar_lea.sflag [#allocation6], %s732_s25 }
 0x1c5   : > { %p1031_p6 = pnand %p1034_p12, %p1814_p8 }
 0x1c7   : > { %1292 = dma.done.wait (!%p1031_p6), %s733_s15, 1024  }
 0x1c8   : > { %1294 = vsyncadd (!%p1031_p6), %s733_s15, 4294966272  ;;  %s24_s30 = sadd.s32 1, %s1345_s30   ;;  %s1816_s11 = sld [smem:[#allocation20_spill]] }
 0x1c9   : > { %p1726_p9 = scmp.ge.s32.totalorder %s24_s30, 10   ;;  %s1817_s1 = sld [smem:[#allocation18_spill]] }
 0x1ca   : > { %s1818_s24 = sld [smem:[#allocation14_spill]]  ;;  %s1819_s25 = sld [smem:[#allocation19_spill]] }
 0x1cb   : > { %s1820_s26 = sld [smem:[#allocation15_spill]]  ;;  %s1821_s28 = sld [smem:[#allocation16_spill]] }
 0x1cc   : > { %s1822_s7 = sld [smem:[#allocation17_spill]]  ;;  %s1823_s18 = smov %s1301_s19 }
 0x1cd   : > { %s1824_s19 = smov %s1305_s20  ;;  %s1826_s21 = smov %s1313_s22 }
 0x1ce   : > { %s1825_s20 = smov %s1816_s11  ;;  %s1827_s22 = smov %s1317_s23 }
 0x1cf   : > { %s1828_s23 = smov %s1817_s1  ;;  %s1829_s27 = smov %s1341_s29 }
 0x1d0   :  { %23 = sbr.rel (!%p1726_p9) target bundleno = 16 (0x10), region = 158 }
 0x1d2   : > { %s1830_s29 = smov %s1822_s7 }
 0x1d7   :  { %738 = vsyncpa [#allocation5], 1 }
 0x1d8   :  { %740 = vsyncpa [#allocation5 + $0x1], 1 }
 0x1d9   :  { %741 = vsyncpa [#allocation8], 1 }
 0x1da   :  { %743 = vsyncpa [#allocation8 + $0x1], 1 }
 0x1db   :  { %744 = vsyncpa [#allocation6], 1 }
 0x1dc   :  { %746 = vsyncpa [#allocation6 + $0x1], 1 }

</bundles_post_ra>
